<compile_context>
chip_gen: v6e
topology: v6e:2x2x1
jax: 0.10.0
libtpu: 0.0.40
codegen_flags: <defaults>
</compile_context>

<pallas_src>
import jax
import jax.numpy as jnp
import numpy as np
from jax.experimental import pallas as pl
from jax.experimental.pallas import tpu as pltpu


LANE = 128
SUBLANE = 8


def _round_up(x, m):
    return (x + m - 1) // m * m


def _pad2(a, rows, cols):
    out = jnp.zeros((rows, cols), a.dtype)
    return out.at[: a.shape[0], : a.shape[1]].set(a)


def _choose_tiling(n_rows, target_tile):
    """Row tiling: big tiles to amortize per-grid-step overhead, but always
    >= 2 steps so the "parallel" grid axis can use both TensorCores on v7x.
    Tile rows are kept a multiple of 8 (sublane)."""
    steps = max(2, pl.cdiv(n_rows, target_tile))
    tile = _round_up(pl.cdiv(n_rows, steps), SUBLANE)
    return tile, tile * steps, steps


def make_mlp_kernel(num_hidden, compute_dtype):
    """Fused MLP over one row tile.

    Ref order: x, [W_l, scale_l, shift_l] * num_hidden, W_last, b_last, out.
    Hidden-layer bias is pre-folded into the BN shift on the host.
    """

    def kernel(*refs):
        x_ref, o_ref = refs[0], refs[-1]
        # x arrives unpadded in f32; cast to bf16 in-kernel (VPU op hidden
        # under the DMA) instead of materializing a padded bf16 copy in HBM.
        h = x_ref[...].astype(compute_dtype)
        idx = 1
        for _ in range(num_hidden):
            w_ref, s_ref, t_ref = refs[idx], refs[idx + 1], refs[idx + 2]
            idx += 3
            z = jnp.dot(h, w_ref[...], preferred_element_type=jnp.float32)
            z = z * s_ref[...] + t_ref[...]                 # eval BN (+ folded bias)
            h = jnp.maximum(z, 0.0).astype(compute_dtype)   # ReLU, bf16 for next MXU
        w_ref, b_ref = refs[idx], refs[idx + 1]
        out = jnp.dot(h, w_ref[...], preferred_element_type=jnp.float32) + b_ref[...]
        o_ref[...] = out.astype(o_ref.dtype)                # linear (no activation) output

    return kernel


def prepare_mlp_params(linears, norms, compute_dtype=jnp.bfloat16):
    """One-time host-side parameter prep (hoisted out of the forward path):
      * fold eval-mode BatchNorm into per-feature scale/shift,
      * fold each hidden Linear bias into the BN shift (shift' = b*scale + shift),
      * pad hidden/output feature dims to 128 lanes (input dim left unpadded),
      * cast matmul weights to bf16; affine params stay f32.

    linears: list of (W[d_in, d_out] f32, b[d_out] f32), one per nn.Linear.
    norms:   list of (scale[d], shift[d]) folded eval BN params, len == L-1.
    Returns (flat param list, real dims, padded dims).
    """
    L = len(linears)
    assert len(norms) == L - 1
    dims = [linears[0][0].shape[0]] + [w.shape[1] for (w, _) in linears]
    # Only kernel-internal / output feature dims need 128-lane padding; x's
    # feature dim (the HBM-facing input) stays unpadded.
    pdims = [dims[0]] + [_round_up(d, LANE) for d in dims[1:]]

    params = []
    for l in range(L):
        w, b = linears[l]
        wp = _pad2(w.astype(compute_dtype), pdims[l], pdims[l + 1])
        if l < L - 1:
            scale, shift = norms[l]
            shift = b * scale + shift          # fold Linear bias into BN shift
            sp = _pad2(scale.reshape(1, -1).astype(jnp.float32), 1, pdims[l + 1])
            tp = _pad2(shift.reshape(1, -1).astype(jnp.float32), 1, pdims[l + 1])
            params += [wp, sp, tp]
        else:
            bp = _pad2(b.reshape(1, -1).astype(jnp.float32), 1, pdims[l + 1])
            params += [wp, bp]
    return params, dims, pdims


def mlp_forward(x, params, dims, pdims, *, target_tile=512,
                compute_dtype=jnp.bfloat16, out_dtype=jnp.float32):
    """Run the fused MLP forward pass on prepared (padded/folded) params.

    out_dtype=jnp.bfloat16 halves the output HBM writeback if downstream
    tolerates it; default stays f32 to match the PyTorch module.
    """
    N, d_in = x.shape
    assert d_in == dims[0]
    L = len(dims) - 1

    tile_n, Np, steps = _choose_tiling(N, target_tile)
    # Only row padding to a tile multiple; feature dim and dtype untouched.
    xp = x if Np == N else jnp.zeros((Np, d_in), x.dtype).at[:N].set(x)

    # x: last block dim == full array dim (exempt from the 128-lane rule).
    in_specs = [pl.BlockSpec((tile_n, d_in), lambda i: (i, 0))]
    for l in range(L):
        # Grid-invariant parameter blocks: constant index_map -> fetched once,
        # kept resident in VMEM across all row tiles.
        in_specs.append(pl.BlockSpec((pdims[l], pdims[l + 1]), lambda i: (0, 0)))
        n_affine = 2 if l < L - 1 else 1
        for _ in range(n_affine):
            in_specs.append(pl.BlockSpec((1, pdims[l + 1]), lambda i: (0, 0)))

    # Honest scheduler hint: real (unpadded) FLOPs / bytes.
    flops = sum(2 * N * dims[l] * dims[l + 1] for l in range(L))
    bytes_accessed = (int(x.size) * x.dtype.itemsize
                      + sum(int(p.size) * p.dtype.itemsize for p in params)
                      + N * dims[-1] * np.dtype(out_dtype).itemsize)

    kernel = make_mlp_kernel(L - 1, compute_dtype)
    out_padded = pl.pallas_call(
        kernel,
        out_shape=jax.ShapeDtypeStruct((Np, pdims[-1]), out_dtype),
        grid_spec=pltpu.PrefetchScalarGridSpec(
            num_scalar_prefetch=0,
            grid=(steps,),
            in_specs=in_specs,
            # 128-lane padded output block -> unmasked lane-dense stores.
            out_specs=pl.BlockSpec((tile_n, pdims[-1]), lambda i: (i, 0)),
        ),
        compiler_params=pltpu.CompilerParams(
            dimension_semantics=("parallel",),
            vmem_limit_bytes=64 * 1024 * 1024),
        cost_estimate=pl.CostEstimate(
            flops=int(flops), transcendentals=0,
            bytes_accessed=int(bytes_accessed)),
    )(xp, *params)

    return out_padded[:N, :dims[-1]]


def mlp_forward_ref(x, linears, norms, compute_dtype=jnp.bfloat16):
    """Pure-JAX reference with the same bf16-in / f32-accumulate numerics
    (bias applied unfolded, to validate the host-side folding)."""
    h = x.astype(compute_dtype)
    L = len(linears)
    for l in range(L - 1):
        w, b = linears[l]
        z = jnp.dot(h, w.astype(compute_dtype),
                    preferred_element_type=jnp.float32) + b.reshape(1, -1)
        s, t = norms[l]
        z = z * s.reshape(1, -1) + t.reshape(1, -1)
        h = jnp.maximum(z, 0.0).astype(compute_dtype)
    w, b = linears[-1]
    return jnp.dot(h, w.astype(compute_dtype),
                   preferred_element_type=jnp.float32) + b.reshape(1, -1)


def init_linear(key, d_in, d_out):
    # nn.Linear default init: U(-1/sqrt(fan_in), 1/sqrt(fan_in)).
    kw, kb = jax.random.split(key)
    bound = 1.0 / jnp.sqrt(jnp.float32(d_in))
    w = jax.random.uniform(kw, (d_in, d_out), jnp.float32, -bound, bound)
    b = jax.random.uniform(kb, (d_out,), jnp.float32, -bound, bound)
    return w, b


def init_batchnorm(key, d, eps=1e-5):
    # Non-trivial eval-mode BatchNorm1d running stats / affine -> scale/shift.
    k1, k2, k3, k4 = jax.random.split(key, 4)
    gamma = jax.random.uniform(k1, (d,), jnp.float32, 0.5, 1.5)
    beta = 0.1 * jax.random.normal(k2, (d,), jnp.float32)
    running_mean = 0.1 * jax.random.normal(k3, (d,), jnp.float32)
    running_var = jax.random.uniform(k4, (d,), jnp.float32, 0.5, 1.5)
    scale = gamma / jnp.sqrt(running_var + eps)
    shift = beta - running_mean * scale
    return scale, shift


if __name__ == "__main__":
    key = jax.random.PRNGKey(0)
    ks = jax.random.split(key, 12)

    # Small, module-consistent sizes; N chosen so the adaptive tiling produces
    # 2 grid steps with a padded-tail row tile.
    N = 200
    num_layers = 3
    input_dim, hidden_dim, output_dim = 16, 32, 16

    x = jax.random.normal(ks[0], (N, input_dim), jnp.float32)

    # Multi-layer MLP: Linear(in->h), Linear(h->h), Linear(h->out);
    # BatchNorm1d(h) + ReLU after each hidden linear.
    dims = [input_dim] + [hidden_dim] * (num_layers - 1) + [output_dim]
    linears = [init_linear(ks[1 + l], dims[l], dims[l + 1])
               for l in range(num_layers)]
    norms = [init_batchnorm(ks[5 + l], dims[l + 1])
             for l in range(num_layers - 1)]

    # One-time host-side prep (weight padding / folding hoisted out of forward).
    params, rdims, pdims = prepare_mlp_params(linears, norms)
    out = jax.block_until_ready(mlp_forward(x, params, rdims, pdims))
    ref = mlp_forward_ref(x, linears, norms)
    assert out.shape == (N, output_dim)
    assert jnp.allclose(out, ref, rtol=1e-3, atol=1e-3), "multi-layer MLP mismatch"

    # num_layers == 1 path (linear_or_not == True): a single nn.Linear.
    w1, b1 = init_linear(ks[9], input_dim, output_dim)
    params1, rdims1, pdims1 = prepare_mlp_params([(w1, b1)], [])
    out1 = jax.block_until_ready(mlp_forward(x, params1, rdims1, pdims1))
    ref1 = mlp_forward_ref(x, [(w1, b1)], [])
    assert out1.shape == (N, output_dim)
    assert jnp.allclose(out1, ref1, rtol=1e-3, atol=1e-3), "single-linear MLP mismatch"

    print("KERNEL_OK")
</pallas_src>

<mosaic_0001>
module attributes {stable_mosaic.version = 11 : i64} {
  func.func @kernel(%arg0: i32, %arg1: memref<104x16xf32, #tpu.memory_space<vmem>>, %arg2: memref<16x128xbf16, #tpu.memory_space<vmem>>, %arg3: memref<1x128xf32, #tpu.memory_space<vmem>>, %arg4: memref<1x128xf32, #tpu.memory_space<vmem>>, %arg5: memref<128x128xbf16, #tpu.memory_space<vmem>>, %arg6: memref<1x128xf32, #tpu.memory_space<vmem>>, %arg7: memref<1x128xf32, #tpu.memory_space<vmem>>, %arg8: memref<128x128xbf16, #tpu.memory_space<vmem>>, %arg9: memref<1x128xf32, #tpu.memory_space<vmem>>, %arg10: memref<104x128xf32, #tpu.memory_space<vmem>>) attributes {dimension_semantics = [#tpu.dimension_semantics<parallel>], iteration_bounds = array<i64: 2>, scalar_prefetch = 0 : i64, scratch_operands = 0 : i64, tpu.core_type = #tpu.core_type<tc>, window_params = [{transform_indices = @transform_0, window_bounds = array<i64: 104, 16>}, {pipeline_mode = #tpu.pipeline_mode<synchronous>, transform_indices = @transform_1, window_bounds = array<i64: 16, 128>}, {pipeline_mode = #tpu.pipeline_mode<synchronous>, transform_indices = @transform_2, window_bounds = array<i64: 1, 128>}, {pipeline_mode = #tpu.pipeline_mode<synchronous>, transform_indices = @transform_3, window_bounds = array<i64: 1, 128>}, {pipeline_mode = #tpu.pipeline_mode<synchronous>, transform_indices = @transform_4, window_bounds = array<i64: 128, 128>}, {pipeline_mode = #tpu.pipeline_mode<synchronous>, transform_indices = @transform_5, window_bounds = array<i64: 1, 128>}, {pipeline_mode = #tpu.pipeline_mode<synchronous>, transform_indices = @transform_6, window_bounds = array<i64: 1, 128>}, {pipeline_mode = #tpu.pipeline_mode<synchronous>, transform_indices = @transform_7, window_bounds = array<i64: 128, 128>}, {pipeline_mode = #tpu.pipeline_mode<synchronous>, transform_indices = @transform_8, window_bounds = array<i64: 1, 128>}, {transform_indices = @transform_9, window_bounds = array<i64: 104, 128>}]} {
    %c0 = arith.constant 0 : index
    %c0_0 = arith.constant 0 : index
    %0 = vector.load %arg1[%c0, %c0_0] : memref<104x16xf32, #tpu.memory_space<vmem>>, vector<104x16xf32>
    %1 = arith.truncf %0 : vector<104x16xf32> to vector<104x16xbf16>
    %c0_1 = arith.constant 0 : index
    %c0_2 = arith.constant 0 : index
    %2 = vector.load %arg2[%c0_1, %c0_2] : memref<16x128xbf16, #tpu.memory_space<vmem>>, vector<16x128xbf16>
    %cst = arith.constant dense<0.000000e+00> : vector<104x128xf32>
    %3 = tpu.matmul %1, %2, %cst {dimension_numbers = #tpu.dot_dimension_numbers<[1], [0], [0], [1], [0, 0, 1, 1], [], []>} : vector<104x16xbf16>, vector<16x128xbf16>, vector<104x128xf32> -> vector<104x128xf32>
    %c0_3 = arith.constant 0 : index
    %c0_4 = arith.constant 0 : index
    %4 = vector.load %arg3[%c0_3, %c0_4] : memref<1x128xf32, #tpu.memory_space<vmem>>, vector<1x128xf32>
    %5 = vector.broadcast %4 : vector<1x128xf32> to vector<104x128xf32>
    %6 = arith.mulf %3, %5 : vector<104x128xf32>
    %c0_5 = arith.constant 0 : index
    %c0_6 = arith.constant 0 : index
    %7 = vector.load %arg4[%c0_5, %c0_6] : memref<1x128xf32, #tpu.memory_space<vmem>>, vector<1x128xf32>
    %8 = vector.broadcast %7 : vector<1x128xf32> to vector<104x128xf32>
    %9 = arith.addf %6, %8 : vector<104x128xf32>
    %cst_7 = arith.constant 0.000000e+00 : f32
    %10 = vector.broadcast %cst_7 : f32 to vector<104x128xf32>
    %11 = arith.maximumf %9, %10 : vector<104x128xf32>
    %12 = arith.truncf %11 : vector<104x128xf32> to vector<104x128xbf16>
    %c0_8 = arith.constant 0 : index
    %c0_9 = arith.constant 0 : index
    %13 = vector.load %arg5[%c0_8, %c0_9] : memref<128x128xbf16, #tpu.memory_space<vmem>>, vector<128x128xbf16>
    %cst_10 = arith.constant dense<0.000000e+00> : vector<104x128xf32>
    %14 = tpu.matmul %12, %13, %cst_10 {dimension_numbers = #tpu.dot_dimension_numbers<[1], [0], [0], [1], [0, 0, 1, 1], [], []>} : vector<104x128xbf16>, vector<128x128xbf16>, vector<104x128xf32> -> vector<104x128xf32>
    %c0_11 = arith.constant 0 : index
    %c0_12 = arith.constant 0 : index
    %15 = vector.load %arg6[%c0_11, %c0_12] : memref<1x128xf32, #tpu.memory_space<vmem>>, vector<1x128xf32>
    %16 = vector.broadcast %15 : vector<1x128xf32> to vector<104x128xf32>
    %17 = arith.mulf %14, %16 : vector<104x128xf32>
    %c0_13 = arith.constant 0 : index
    %c0_14 = arith.constant 0 : index
    %18 = vector.load %arg7[%c0_13, %c0_14] : memref<1x128xf32, #tpu.memory_space<vmem>>, vector<1x128xf32>
    %19 = vector.broadcast %18 : vector<1x128xf32> to vector<104x128xf32>
    %20 = arith.addf %17, %19 : vector<104x128xf32>
    %cst_15 = arith.constant 0.000000e+00 : f32
    %21 = vector.broadcast %cst_15 : f32 to vector<104x128xf32>
    %22 = arith.maximumf %20, %21 : vector<104x128xf32>
    %23 = arith.truncf %22 : vector<104x128xf32> to vector<104x128xbf16>
    %c0_16 = arith.constant 0 : index
    %c0_17 = arith.constant 0 : index
    %24 = vector.load %arg8[%c0_16, %c0_17] : memref<128x128xbf16, #tpu.memory_space<vmem>>, vector<128x128xbf16>
    %cst_18 = arith.constant dense<0.000000e+00> : vector<104x128xf32>
    %25 = tpu.matmul %23, %24, %cst_18 {dimension_numbers = #tpu.dot_dimension_numbers<[1], [0], [0], [1], [0, 0, 1, 1], [], []>} : vector<104x128xbf16>, vector<128x128xbf16>, vector<104x128xf32> -> vector<104x128xf32>
    %c0_19 = arith.constant 0 : index
    %c0_20 = arith.constant 0 : index
    %26 = vector.load %arg9[%c0_19, %c0_20] : memref<1x128xf32, #tpu.memory_space<vmem>>, vector<1x128xf32>
    %27 = vector.broadcast %26 : vector<1x128xf32> to vector<104x128xf32>
    %28 = arith.addf %25, %27 : vector<104x128xf32>
    %c0_21 = arith.constant 0 : index
    %c0_22 = arith.constant 0 : index
    %29 = vector.load %arg10[%c0_21, %c0_22] : memref<104x128xf32, #tpu.memory_space<vmem>>, vector<104x128xf32>
    tpu.vector_store %arg10[%c0_21, %c0_22], %28 {strides = array<i32>} : memref<104x128xf32, #tpu.memory_space<vmem>>, vector<104x128xf32>,
    return
  }
  func.func @transform_0(%arg0: i32) -> (i32, i32) {
    %c0_i32 = arith.constant 0 : i32
    %c0_i32_0 = arith.constant 0 : i32
    return %arg0, %c0_i32 : i32, i32
  }
  func.func @transform_1(%arg0: i32) -> (i32, i32) {
    %c0_i32 = arith.constant 0 : i32
    %c0_i32_0 = arith.constant 0 : i32
    %c0_i32_1 = arith.constant 0 : i32
    return %c0_i32, %c0_i32_0 : i32, i32
  }
  func.func @transform_2(%arg0: i32) -> (i32, i32) {
    %c0_i32 = arith.constant 0 : i32
    %c0_i32_0 = arith.constant 0 : i32
    %c0_i32_1 = arith.constant 0 : i32
    return %c0_i32, %c0_i32_0 : i32, i32
  }
  func.func @transform_3(%arg0: i32) -> (i32, i32) {
    %c0_i32 = arith.constant 0 : i32
    %c0_i32_0 = arith.constant 0 : i32
    %c0_i32_1 = arith.constant 0 : i32
    return %c0_i32, %c0_i32_0 : i32, i32
  }
  func.func @transform_4(%arg0: i32) -> (i32, i32) {
    %c0_i32 = arith.constant 0 : i32
    %c0_i32_0 = arith.constant 0 : i32
    %c0_i32_1 = arith.constant 0 : i32
    return %c0_i32, %c0_i32_0 : i32, i32
  }
  func.func @transform_5(%arg0: i32) -> (i32, i32) {
    %c0_i32 = arith.constant 0 : i32
    %c0_i32_0 = arith.constant 0 : i32
    %c0_i32_1 = arith.constant 0 : i32
    return %c0_i32, %c0_i32_0 : i32, i32
  }
  func.func @transform_6(%arg0: i32) -> (i32, i32) {
    %c0_i32 = arith.constant 0 : i32
    %c0_i32_0 = arith.constant 0 : i32
    %c0_i32_1 = arith.constant 0 : i32
    return %c0_i32, %c0_i32_0 : i32, i32
  }
  func.func @transform_7(%arg0: i32) -> (i32, i32) {
    %c0_i32 = arith.constant 0 : i32
    %c0_i32_0 = arith.constant 0 : i32
    %c0_i32_1 = arith.constant 0 : i32
    return %c0_i32, %c0_i32_0 : i32, i32
  }
  func.func @transform_8(%arg0: i32) -> (i32, i32) {
    %c0_i32 = arith.constant 0 : i32
    %c0_i32_0 = arith.constant 0 : i32
    %c0_i32_1 = arith.constant 0 : i32
    return %c0_i32, %c0_i32_0 : i32, i32
  }
  func.func @transform_9(%arg0: i32) -> (i32, i32) {
    %c0_i32 = arith.constant 0 : i32
    %c0_i32_0 = arith.constant 0 : i32
    return %arg0, %c0_i32 : i32, i32
  }
}

</mosaic_0001>

<bundles_post_ra>
// kernel: tpu_custom_call.1
= control target key start
LH: loop header
LB: loop body
LE: loop exit
PB: predicated region body
PF: predicated region fallthrough
CT: control target
= control target key end

     0   :  { %14 = vsyncpa [#allocation3], 0  ;;  %s1696_s0 = inlined_call_operand.vmem [shape: f32[208,16], index: 0, kind: input, shape index: {}]   ;;  %s1697_s1 = inlined_call_operand.vmem [shape: bf16[16,128], index: 1, kind: input, shape index: {}]   ;;  %s1698_s2 = inlined_call_operand.vmem [shape: f32[1,128], index: 2, kind: input, shape index: {}]   ;;  %s1699_s3 = inlined_call_operand.vmem [shape: f32[1,128], index: 3, kind: input, shape index: {}]   ;;  %s1700_s4 = inlined_call_operand.vmem [shape: bf16[128,128], index: 4, kind: input, shape index: {}]   ;;  %s1701_s5 = inlined_call_operand.vmem [shape: f32[1,128], index: 5, kind: input, shape index: {}]   ;;  %s1702_s6 = inlined_call_operand.vmem [shape: f32[1,128], index: 6, kind: input, shape index: {}]   ;;  %s1703_s7 = inlined_call_operand.vmem [shape: bf16[128,128], index: 7, kind: input, shape index: {}]   ;;  %s1704_s8 = inlined_call_operand.vmem [shape: f32[1,128], index: 8, kind: input, shape index: {}]   ;;  %s1705_s9 = inlined_call_operand.hbm [shape: f32[208,128], index: 9, kind: output, shape index: {}]  }
   0x1   :  { %16 = vsyncpa [#allocation3 + $0x1], 0  ;;  %s1367_s30 = smov 0   ;;  %s1369_s10 = smov 0  }
   0x2   :  { %s1371_s11 = smov 0   ;;  %s1373_s12 = smov 0  }
   0x3 LB: > { %s1388_s13 = sadd.s32 4294967295, %s1310_s12   ;;  %s993_s14 = sadd.s32 4294967294, %s1310_s12   ;;  %s1310_s12 = sphi %s1373_s12, %s1711_s12   ;;  %s1306_s11 = sphi %s1371_s11, %s1710_s11   ;;  %s1302_s10 = sphi %s1369_s10, %s1709_s10   ;;  %s1298_s30 = sphi %s1367_s30, %s1708_s30  }
   0x4   : > { %s1392_s15 = sadd.s32 1, %s1310_s12   ;;  %s223_s16 = sadd.s32 1, %s1306_s11 }
   0x5   : > { %s220_s17 = ssub.s32 %s1310_s12, %s1392_s15  ;;  %p233_p0 = scmp.ne.s32.totalorder %s1306_s11, %s1302_s10 }
   0x6   : > { %p221_p1 = scmp.eq.s32.totalorder %s220_s17, 0  ;;  %p234_p2 = scmp.eq.s32.totalorder %s1388_s13, 1 }
   0x7   : > { %p239_p3 = scmp.ne.s32.totalorder %s1302_s10, %s1298_s30  ;;  %p240_p4 = scmp.eq.s32.totalorder %s993_s14, 1 }
   0x8   : > { %s1403_s18 = scalar_select %p221_p1, %s1306_s11, %s223_s16  }
   0x9   : > { %p1405_p5 = por %p234_p2, %p233_p0  ;;  %p1409_p6 = por %p240_p4, %p239_p3 }
   0xa   : > { %p996_p7 = scmp.ge.s32.totalorder %s1310_s12, 1  ;;  %p291_p8 = scmp.lt.s32.totalorder %s1310_s12, 3 }
   0xc   : > { %p292_p9 = pnand %p996_p7, %p291_p8 }
   0xd   : > { %s327_s23 = smul.u32 (!%p292_p9), 13, %s1388_s13  ;;  %s324_s17 = sand.u32 (!%p292_p9), 1, %s1302_s10  }
   0xe   : > { %295 = sbr.rel (%p292_p9) target bundleno = 693 (0x2b5), region = 56  ;;  %s1314_s16 = smov (!%p292_p9), [#allocation2]  }
   0xf   : > { %p328_p10 = scmp.lt.s32.totalorder (!%p292_p9), %s327_s23, 25  ;;  %s1189_s21 = smul.u32 (!%p292_p9), 104, %s324_s17 }
  0x10   : > { %s1030_s25 = smul.u32 (!%p292_p9), 1664, %s1388_s13  ;;  %s1656_s13 = scalar_lea.sflag (!%p292_p9), [#allocation3], %s324_s17 }
  0x12   : > { %s1649_s29 = scalar_lea.hbm (!%p292_p9), %s1705_s9, %s1030_s25 }
  0x13   : > { %v1233_v0 = vld [vmem:[%s1697_s1] sm:$0xff]   ;;  %v1312_v1 = vmov 0.0   ;;  %vm1313_vm0 = vmmov 0   ;;  %s1713_s23 = smov (!%p328_p10, %s327_s23), 25  ;;  %vm363_vm1 = vcmask 130048   ;;  %v1234_v8 = vld [vmem:[%s1700_s4 + $0x38] sm:$0xff]  }
  0x14   : > { %1069 = vmatprep.subr.bf16.mxu0 %v1312_v1  ;;  %1187 = vmatprep.subr.bf16.mxu1 %v1312_v1  ;;  %s997_s24 = sshll.u32 %s1713_s23, 3  ;;  %v1235_v13 = vld [vmem:[%s1700_s4 + $0x30] sm:$0xff]   ;;  %v1236_v16 = vld [vmem:[%s1700_s4 + $0x28] sm:$0xff]   ;;  %v1237_v21 = vld [vmem:[%s1700_s4 + $0x20] sm:$0xff]  }
  0x15   : > { %1070 = vmatpush3.bf16.msra.mxu0 %v1233_v0  ;;  %1071 = vmatprep.mubr.msk.bf16.mxu0 %vm1313_vm0, %v1312_v1  ;;  %s1430_s27 = scalar_lea.vmem %s1696_s0, %s997_s24  ;;  %v1238_v23 = vld [vmem:[%s1700_s4 + $0x18] sm:$0xff]   ;;  %v1239_v27 = vld [vmem:[%s1700_s4 + $0x10] sm:$0xff]   ;;  %v1240_v28 = vld [vmem:[%s1700_s4 + $0x8] sm:$0xff]   ;;  %s1630_s24 = scalar_lea.vmem [#allocation2], %s1189_s21 }
  0x16   : > { %1188 = vmatpush3.bf16.msra.mxu1 %v1233_v0  ;;  %1087 = vmatprep.mubr.msk.bf16.mxu1 %vm1313_vm0, %v1312_v1  ;;  %v335_v2 = vld [vmem:[%s1430_s27] sm:$0xff]  ;;  %v336_v3 = vld [vmem:[%s1430_s27 + $0x8] sm:$0xff]  ;;  %v337_v6 = vld [vmem:[%s1430_s27 + $0x10] sm:$0xff]  ;;  %s931_s26 = sshll.u32 %s1630_s24, 4  ;;  %s1254_s21 = sshll.u32 %s1314_s16, 4  ;;  %s1651_s26 = int_to_ptr.vmem [resolvable:$true] %s931_s26  ;;  %s1255_s21 = int_to_ptr.vmem [resolvable:$false] %s1254_s21 }
  0x17   : > { %1099 = vmatprep.subr.bf16.mxu1 %v1312_v1  ;;  %1143 = vmatprep.subr.bf16.mxu0 %v1312_v1  ;;  %v348_v4 = vpack.c.bf16 %v336_v3, %v335_v2  ;;  %v343_v5 = vld [vmem:[%s1430_s27 + $0x40] sm:$0xff]  ;;  %v344_v7 = vld [vmem:[%s1430_s27 + $0x48] sm:$0xff]  ;;  %v338_v9 = vld [vmem:[%s1430_s27 + $0x18] sm:$0xff]  ;;  %s1250_s14 = scalar_lea.vmem %s1651_s26, 1664  ;;  %s1256_s22 = scalar_lea.vmem %s1255_s21, 3328 }
  0x18   : > { %v352_v10 = vpack.c.bf16 %v344_v7, %v343_v5  ;;  %v345_v11 = vld [vmem:[%s1430_s27 + $0x50] sm:$0xff]  ;;  %v346_v12 = vld [vmem:[%s1430_s27 + $0x58] sm:$0xff]  ;;  %v349_v14 = vpack.c.bf16 %v338_v9, %v337_v6  ;;  %v339_v17 = vld [vmem:[%s1430_s27 + $0x20] sm:$0xff]  ;;  %p1251_p11 = scmp.ne.s32.totalorder %s1651_s26, %s1250_s14  ;;  %p1257_p0 = scmp.lt.s32.totalorder %s1651_s26, %s1255_s21 }
  0x19   : > { %1072 = vmatmul.mubr.msk.bf16.vlgmr.msra.gmra.mxu0 %vm363_vm1, %v348_v4  ;;  %v353_v15 = vpack.c.bf16 %v346_v12, %v345_v11  ;;  %v340_v18 = vld [vmem:[%s1430_s27 + $0x28] sm:$0xff]  ;;  %v347_v20 = vld [vmem:[%s1430_s27 + $0x60] sm:$0xff]  ;;  %v341_v24 = vld [vmem:[%s1430_s27 + $0x30] sm:$0xff]  ;;  %p1258_p1 = scmp.lt.s32.totalorder %s1256_s22, %s1250_s14 }
  0x1a   : > { %1075 = vmatprep.mubr.msk.bf16.mxu0 %vm1313_vm0, %v1312_v1  ;;  %1088 = vmatmul.mubr.msk.bf16.vlgmr.msra.gmra.mxu1 %vm363_vm1, %v352_v10  ;;  %v350_v19 = vpack.c.bf16 %v340_v18, %v339_v17  ;;  %v354_v22 = vpack.c.bf16 %v347_v20, %v347_v20  ;;  %v342_v25 = vld [vmem:[%s1430_s27 + $0x38] sm:$0xff]  ;;  %v1241_v29 = vld [vmem:[%s1700_s4] sm:$0xff]   ;;  %v1243_v31 = vld [vmem:[%s1703_s7 + $0x30] sm:$0xff]   ;;  %p1252_p12 = pnand %p1251_p11, %p1405_p5 }
  0x1b   : > { %1091 = vmatprep.mubr.msk.bf16.mxu1 %vm1313_vm0, %v1312_v1  ;;  %1100 = vmatpush3.bf16.msra.mxu1 %v1234_v8  ;;  %v351_v26 = vpack.c.bf16 %v342_v25, %v341_v24  ;;  %v1242_v30 = vld [vmem:[%s1703_s7 + $0x38] sm:$0xff]   ;;  %v1244_v32 = vld [vmem:[%s1703_s7 + $0x28] sm:$0xff]   ;;  %v1245_v33 = vld [vmem:[%s1703_s7 + $0x20] sm:$0xff]   ;;  %p1259_p2 = por %p1258_p1, %p1257_p0 }
  0x1c   : > { %1101 = vmatprep.subr.bf16.mxu1 %v1312_v1  ;;  %1144 = vmatpush3.bf16.msra.mxu0 %v1242_v30  ;;  %v1246_v34 = vld [vmem:[%s1703_s7 + $0x18] sm:$0xff]   ;;  %v1520_v35 = vld [vmem:[%s1698_s2] ss:$0 sm:$0xff]  ;;  %p1253_p13 = pneg %p1252_p12 }
  0x1d   : > { %1145 = vmatprep.subr.bf16.mxu0 %v1312_v1  ;;  %v1526_v38 = vld [vmem:[%s1699_s3] ss:$0 sm:$0xff] }
  0x1e   : > { %p1260_p3 = pnand %p1259_p2, %p1253_p13 }
  0x1f   : > { %1102 = vmatpush3.bf16.msra.mxu1 %v1235_v13 }
  0x20   : > { %1103 = vmatprep.subr.bf16.mxu1 %v1312_v1  ;;  %1146 = vmatpush3.bf16.msra.mxu0 %v1243_v31 }
  0x21   : > { %1076 = vmatmul.mubr.msk.bf16.gmra.mxu0 %vm363_vm1, %v349_v14  ;;  %1147 = vmatprep.subr.bf16.mxu0 %v1312_v1 }
  0x22   : > { %1079 = vmatprep.mubr.msk.bf16.mxu0 %vm1313_vm0, %v1312_v1  ;;  %1092 = vmatmul.mubr.msk.bf16.gmra.mxu1 %vm363_vm1, %v353_v15 }
  0x23   : > { %1095 = vmatprep.mubr.msk.bf16.mxu1 %vm1313_vm0, %v1312_v1  ;;  %1104 = vmatpush3.bf16.msra.mxu1 %v1236_v16 }
  0x24   : > { %1105 = vmatprep.subr.bf16.mxu1 %v1312_v1  ;;  %1148 = vmatpush3.bf16.msra.mxu0 %v1244_v32 }
  0x25   : > { %1149 = vmatprep.subr.bf16.mxu0 %v1312_v1 }
  0x27   : > { %1106 = vmatpush3.bf16.msra.mxu1 %v1237_v21 }
  0x28   : > { %1107 = vmatprep.subr.bf16.mxu1 %v1312_v1  ;;  %1150 = vmatpush3.bf16.msra.mxu0 %v1245_v33 }
  0x29   : > { %1080 = vmatmul.mubr.msk.bf16.gmra.mxu0 %vm363_vm1, %v350_v19  ;;  %1151 = vmatprep.subr.bf16.mxu0 %v1312_v1 }
  0x2a   : > { %1083 = vmatprep.mubr.msk.bf16.mxu0 %vm1313_vm0, %v1312_v1  ;;  %1096 = vmatmul.mubr.msk.bf16.gmra.mxu1 %vm363_vm1, %v354_v22 }
  0x2b   : > { %1108 = vmatpush3.bf16.msra.mxu1 %v1238_v23  ;;  %1115 = vmatprep.mubr.msk.bf16.mxu1 %vm1313_vm0, %v1312_v1 }
  0x2c   : > { %1109 = vmatprep.subr.bf16.mxu1 %v1312_v1  ;;  %1152 = vmatpush3.bf16.msra.mxu0 %v1246_v34 }
  0x2d   : > { %1153 = vmatprep.subr.bf16.mxu0 %v1312_v1 }
  0x2f   : > { %1110 = vmatpush3.bf16.msra.mxu1 %v1239_v27 }
  0x30   : > { %1111 = vmatprep.subr.bf16.mxu1 %v1312_v1 }
  0x31   : > { %1084 = vmatmul.mubr.msk.bf16.gmra.mxu0 %vm363_vm1, %v351_v26 }
  0x32   : > { %1159 = vmatprep.mubr.msk.bf16.mxu0 %vm1313_vm0, %v1312_v1 }
  0x33   : > { %1112 = vmatpush3.bf16.msra.mxu1 %v1240_v28 }
  0x34   : > { %1113 = vmatprep.subr.bf16.mxu1 %v1312_v1 }
  0x37   : > { %1114 = vmatpush3.bf16.msra.mxu1 %v1241_v29 }
  0xd9   : > { %v419_v36 = vpop.f32.mrf.mxu0 }
  0xda   : > { %v480_v37 = vmul.f32 %v1520_v35, %v419_v36  ;;  %v451_v40 = vpop.f32.mrf.mxu1 }
  0xdb   : > { %v1073_v39 = vpop.f32.mrf.mxu0  ;;  %v488_v26 = vmul.f32 %v1520_v35, %v451_v40 }
  0xdc   : > { %v500_v42 = vadd.f32 %v1526_v38, %v480_v37  ;;  %v1089_v44 = vpop.f32.mrf.mxu1 }
  0xdd   : > { %v422_v41 = vpop.f32.mrf.mxu0  ;;  %v508_v31 = vadd.f32 %v1526_v38, %v488_v26 }
  0xde   : > { %v481_v43 = vmul.f32 %v1520_v35, %v422_v41  ;;  %v454_v47 = vpop.f32.mrf.mxu1  ;;  %v513_v49 = vmax.f32 %v500_v42, 0.0 }
  0xdf   : > { %v1074_v45 = vpop.f32.mrf.mxu0  ;;  %v489_v28 = vmul.f32 %v1520_v35, %v454_v47  ;;  %v521_v34 = vmax.f32 %v508_v31, 0.0 }
  0xe0   : > { %v501_v46 = vadd.f32 %v1526_v38, %v481_v43  ;;  %v1090_v52 = vpop.f32.mrf.mxu1 }
  0xe1   : > { %v427_v48 = vpop.f32.mrf.mxu0  ;;  %v509_v32 = vadd.f32 %v1526_v38, %v489_v28 }
  0xe2   : > { %v514_v50 = vmax.f32 %v501_v46, 0.0  ;;  %v482_v51 = vmul.f32 %v1520_v35, %v427_v48  ;;  %v459_v55 = vpop.f32.mrf.mxu1 }
  0xe3   : > { %v1077_v53 = vpop.f32.mrf.mxu0  ;;  %v522_v36 = vmax.f32 %v509_v32, 0.0  ;;  %v490_v37 = vmul.f32 %v1520_v35, %v459_v55 }
  0xe4   : > { %v526_v54 = vpack.c.bf16 %v514_v50, %v513_v49  ;;  %v502_v57 = vadd.f32 %v1526_v38, %v482_v51  ;;  %v1093_v59 = vpop.f32.mrf.mxu1  ;;  %v1247_v50 = vld [vmem:[%s1703_s7 + $0x10] sm:$0xff]   ;;  %v1579_v51 = vld [vmem:[%s1701_s5] ss:$0 sm:$0xff] }
  0xe5   : > { %v430_v56 = vpop.f32.mrf.mxu0  ;;  %v510_v40 = vadd.f32 %v1526_v38, %v490_v37  ;;  %v530_v42 = vpack.c.bf16 %v522_v36, %v521_v34  ;;  %1154 = vmatpush3.bf16.msra.mxu0 %v1247_v50 }
  0xe6   : > { %v483_v58 = vmul.f32 %v1520_v35, %v430_v56  ;;  %1116 = vmatmul.mubr.bf16.vlgmr.msra.gmra.mxu1 %v526_v54  ;;  %v462_v62 = vpop.f32.mrf.mxu1  ;;  %v515_v0 = vmax.f32 %v502_v57, 0.0  ;;  %1155 = vmatprep.subr.bf16.mxu0 %v1312_v1  ;;  %v1585_v54 = vld [vmem:[%s1702_s6] ss:$0 sm:$0xff] }
  0xe7   : > { %v1078_v60 = vpop.f32.mrf.mxu0  ;;  %1119 = vmatprep.mubr.msk.bf16.mxu1 %vm1313_vm0, %v1312_v1  ;;  %v491_v39 = vmul.f32 %v1520_v35, %v462_v62  ;;  %v523_v44 = vmax.f32 %v510_v40, 0.0 }
  0xe8   : > { %v503_v61 = vadd.f32 %v1526_v38, %v483_v58  ;;  %v1094_v4 = vpop.f32.mrf.mxu1 }
  0xe9   : > { %v435_v63 = vpop.f32.mrf.mxu0  ;;  %v511_v41 = vadd.f32 %v1526_v38, %v491_v39 }
  0xea   : > { %v516_v2 = vmax.f32 %v503_v61, 0.0  ;;  %v484_v3 = vmul.f32 %v1520_v35, %v435_v63  ;;  %v467_v7 = vpop.f32.mrf.mxu1 }
  0xeb   : > { %v1081_v5 = vpop.f32.mrf.mxu0  ;;  %v492_v43 = vmul.f32 %v1520_v35, %v467_v7  ;;  %v524_v45 = vmax.f32 %v511_v41, 0.0 }
  0xec   : > { %v527_v6 = vpack.c.bf16 %v516_v2, %v515_v0  ;;  %v504_v9 = vadd.f32 %v1526_v38, %v484_v3  ;;  %v1097_v11 = vpop.f32.mrf.mxu1 }
  0xed   : > { %v438_v8 = vpop.f32.mrf.mxu0  ;;  %v512_v46 = vadd.f32 %v1526_v38, %v492_v43  ;;  %v531_v47 = vpack.c.bf16 %v524_v45, %v523_v44 }
  0xee   : > { %v485_v10 = vmul.f32 %v1520_v35, %v438_v8  ;;  %1120 = vmatmul.mubr.bf16.gmra.mxu1 %v527_v6  ;;  %v470_v14 = vpop.f32.mrf.mxu1  ;;  %v517_v16 = vmax.f32 %v504_v9, 0.0 }
  0xef   : > { %v1082_v12 = vpop.f32.mrf.mxu0  ;;  %1123 = vmatprep.mubr.msk.bf16.mxu1 %vm1313_vm0, %v1312_v1  ;;  %v525_v48 = vmax.f32 %v512_v46, 0.0 }
  0xf0   : > { %v505_v13 = vadd.f32 %v1526_v38, %v485_v10  ;;  %v1098_v19 = vpop.f32.mrf.mxu1 }
  0xf1   : > { %v443_v15 = vpop.f32.mrf.mxu0  ;;  %v532_v49 = vpack.c.bf16 %v525_v48, %v525_v48 }
  0xf2   : > { %v518_v17 = vmax.f32 %v505_v13, 0.0  ;;  %v486_v18 = vmul.f32 %v1520_v35, %v443_v15 }
  0xf3   : > { %v1085_v20 = vpop.f32.mrf.mxu0 }
  0xf4   : > { %v528_v21 = vpack.c.bf16 %v518_v17, %v517_v16  ;;  %v506_v23 = vadd.f32 %v1526_v38, %v486_v18 }
  0xf5   : > { %v446_v22 = vpop.f32.mrf.mxu0 }
  0xf6   : > { %v487_v24 = vmul.f32 %v1520_v35, %v446_v22  ;;  %1124 = vmatmul.mubr.bf16.gmra.mxu1 %v528_v21  ;;  %v519_v29 = vmax.f32 %v506_v23, 0.0  ;;  %v1248_v35 = vld [vmem:[%s1703_s7 + $0x8] sm:$0xff]  }
  0xf7   : > { %v1086_v25 = vpop.f32.mrf.mxu0  ;;  %1127 = vmatprep.mubr.msk.bf16.mxu1 %vm1313_vm0, %v1312_v1  ;;  %1156 = vmatpush3.bf16.msra.mxu0 %v1248_v35 }
  0xf8   : > { %v507_v27 = vadd.f32 %v1526_v38, %v487_v24  ;;  %1157 = vmatprep.subr.bf16.mxu0 %v1312_v1  ;;  %v1249_v38 = vld [vmem:[%s1703_s7] sm:$0xff]  }
  0xfa   : > { %v520_v30 = vmax.f32 %v507_v27, 0.0 }
  0xfb   : > { %1158 = vmatpush3.bf16.msra.mxu0 %v1249_v38 }
  0xfc   : > { %v529_v33 = vpack.c.bf16 %v520_v30, %v519_v29 }
  0xfe   : > { %1128 = vmatmul.mubr.bf16.gmra.mxu1 %v529_v33 }
  0xff   : > { %1131 = vmatprep.mubr.msk.bf16.mxu1 %vm1313_vm0, %v1312_v1 }
 0x106   : > { %1132 = vmatmul.mubr.bf16.gmra.mxu1 %v530_v42 }
 0x107   : > { %1135 = vmatprep.mubr.msk.bf16.mxu1 %vm1313_vm0, %v1312_v1 }
 0x10e   : > { %1136 = vmatmul.mubr.bf16.gmra.mxu1 %v531_v47 }
 0x10f   : > { %1139 = vmatprep.mubr.msk.bf16.mxu1 %vm1313_vm0, %v1312_v1 }
 0x116   : > { %1140 = vmatmul.mubr.bf16.gmra.mxu1 %v532_v49 }
 0x1a6   : > { %v631_v52 = vpop.f32.mrf.mxu1 }
 0x1a7   : > { %v692_v53 = vmul.f32 %v1579_v51, %v631_v52 }
 0x1a8   : > { %v1117_v55 = vpop.f32.mrf.mxu1 }
 0x1a9   : > { %v712_v57 = vadd.f32 %v1585_v54, %v692_v53 }
 0x1aa   : > { %v634_v56 = vpop.f32.mrf.mxu1 }
 0x1ab   : > { %v693_v58 = vmul.f32 %v1579_v51, %v634_v56  ;;  %v725_v62 = vmax.f32 %v712_v57, 0.0 }
 0x1ac   : > { %v1118_v59 = vpop.f32.mrf.mxu1 }
 0x1ad   : > { %v713_v60 = vadd.f32 %v1585_v54, %v693_v58 }
 0x1ae   : > { %v639_v61 = vpop.f32.mrf.mxu1 }
 0x1af   : > { %v726_v63 = vmax.f32 %v713_v60, 0.0  ;;  %v694_v0 = vmul.f32 %v1579_v51, %v639_v61 }
 0x1b0   : > { %v1121_v2 = vpop.f32.mrf.mxu1 }
 0x1b1   : > { %v738_v3 = vpack.c.bf16 %v726_v63, %v725_v62  ;;  %v714_v5 = vadd.f32 %v1585_v54, %v694_v0 }
 0x1b2   : > { %v642_v4 = vpop.f32.mrf.mxu1 }
 0x1b3   : > { %v695_v6 = vmul.f32 %v1579_v51, %v642_v4  ;;  %1160 = vmatmul.mubr.bf16.vlgmr.msra.gmra.mxu0 %v738_v3  ;;  %v727_v10 = vmax.f32 %v714_v5, 0.0 }
 0x1b4   : > { %v1122_v7 = vpop.f32.mrf.mxu1  ;;  %1163 = vmatprep.mubr.msk.bf16.mxu0 %vm1313_vm0, %v1312_v1 }
 0x1b5   : > { %v715_v8 = vadd.f32 %v1585_v54, %v695_v6 }
 0x1b6   : > { %v647_v9 = vpop.f32.mrf.mxu1 }
 0x1b7   : > { %v728_v11 = vmax.f32 %v715_v8, 0.0  ;;  %v696_v12 = vmul.f32 %v1579_v51, %v647_v9 }
 0x1b8   : > { %v1125_v13 = vpop.f32.mrf.mxu1 }
 0x1b9   : > { %v739_v14 = vpack.c.bf16 %v728_v11, %v727_v10  ;;  %v716_v16 = vadd.f32 %v1585_v54, %v696_v12 }
 0x1ba   : > { %v650_v15 = vpop.f32.mrf.mxu1 }
 0x1bb   : > { %v697_v17 = vmul.f32 %v1579_v51, %v650_v15  ;;  %1164 = vmatmul.mubr.bf16.gmra.mxu0 %v739_v14  ;;  %v729_v21 = vmax.f32 %v716_v16, 0.0 }
 0x1bc   : > { %v1126_v18 = vpop.f32.mrf.mxu1  ;;  %1167 = vmatprep.mubr.msk.bf16.mxu0 %vm1313_vm0, %v1312_v1 }
 0x1bd   : > { %v717_v19 = vadd.f32 %v1585_v54, %v697_v17 }
 0x1be   : > { %v655_v20 = vpop.f32.mrf.mxu1 }
 0x1bf   : > { %v730_v22 = vmax.f32 %v717_v19, 0.0  ;;  %v698_v23 = vmul.f32 %v1579_v51, %v655_v20 }
 0x1c0   : > { %v1129_v24 = vpop.f32.mrf.mxu1 }
 0x1c1   : > { %v740_v25 = vpack.c.bf16 %v730_v22, %v729_v21  ;;  %v718_v27 = vadd.f32 %v1585_v54, %v698_v23 }
 0x1c2   : > { %v658_v26 = vpop.f32.mrf.mxu1 }
 0x1c3   : > { %v699_v28 = vmul.f32 %v1579_v51, %v658_v26  ;;  %1168 = vmatmul.mubr.bf16.gmra.mxu0 %v740_v25  ;;  %v731_v32 = vmax.f32 %v718_v27, 0.0 }
 0x1c4   : > { %v1130_v29 = vpop.f32.mrf.mxu1  ;;  %1171 = vmatprep.mubr.msk.bf16.mxu0 %vm1313_vm0, %v1312_v1 }
 0x1c5   : > { %v719_v30 = vadd.f32 %v1585_v54, %v699_v28 }
 0x1c6   : > { %v663_v31 = vpop.f32.mrf.mxu1 }
 0x1c7   : > { %v732_v33 = vmax.f32 %v719_v30, 0.0  ;;  %v700_v34 = vmul.f32 %v1579_v51, %v663_v31 }
 0x1c8   : > { %v1133_v36 = vpop.f32.mrf.mxu1 }
 0x1c9   : > { %v741_v37 = vpack.c.bf16 %v732_v33, %v731_v32  ;;  %v720_v40 = vadd.f32 %v1585_v54, %v700_v34 }
 0x1ca   : > { %v666_v39 = vpop.f32.mrf.mxu1 }
 0x1cb   : > { %v701_v41 = vmul.f32 %v1579_v51, %v666_v39  ;;  %1172 = vmatmul.mubr.bf16.gmra.mxu0 %v741_v37  ;;  %v733_v45 = vmax.f32 %v720_v40, 0.0 }
 0x1cc   : > { %v1134_v42 = vpop.f32.mrf.mxu1  ;;  %1175 = vmatprep.mubr.msk.bf16.mxu0 %vm1313_vm0, %v1312_v1 }
 0x1cd   : > { %v721_v43 = vadd.f32 %v1585_v54, %v701_v41 }
 0x1ce   : > { %v671_v44 = vpop.f32.mrf.mxu1 }
 0x1cf   : > { %v734_v46 = vmax.f32 %v721_v43, 0.0  ;;  %v702_v47 = vmul.f32 %v1579_v51, %v671_v44 }
 0x1d0   : > { %v1137_v48 = vpop.f32.mrf.mxu1 }
 0x1d1   : > { %v742_v49 = vpack.c.bf16 %v734_v46, %v733_v45  ;;  %v722_v35 = vadd.f32 %v1585_v54, %v702_v47 }
 0x1d2   : > { %v674_v50 = vpop.f32.mrf.mxu1 }
 0x1d3   : > { %v703_v38 = vmul.f32 %v1579_v51, %v674_v50  ;;  %1176 = vmatmul.mubr.bf16.gmra.mxu0 %v742_v49  ;;  %v735_v56 = vmax.f32 %v722_v35, 0.0 }
 0x1d4   : > { %v1138_v52 = vpop.f32.mrf.mxu1  ;;  %1179 = vmatprep.mubr.msk.bf16.mxu0 %vm1313_vm0, %v1312_v1 }
 0x1d5   : > { %v723_v53 = vadd.f32 %v1585_v54, %v703_v38 }
 0x1d6   : > { %v679_v55 = vpop.f32.mrf.mxu1 }
 0x1d7   : > { %v736_v57 = vmax.f32 %v723_v53, 0.0  ;;  %v704_v58 = vmul.f32 %v1579_v51, %v679_v55  ;;  %v1018_v51 = vld [vmem:[%s1704_s8] ss:$0 sm:$0xff] }
 0x1d8   : > { %v1141_v59 = vpop.f32.mrf.mxu1 }
 0x1d9   : > { %v724_v60 = vadd.f32 %v1585_v54, %v704_v58  ;;  %v743_v61 = vpack.c.bf16 %v736_v57, %v735_v56 }
 0x1da   : > { %v682_v62 = vpop.f32.mrf.mxu1 }
 0x1db   : > { %v737_v63 = vmax.f32 %v724_v60, 0.0  ;;  %1180 = vmatmul.mubr.bf16.gmra.mxu0 %v743_v61 }
 0x1dc   : > { %v1142_v0 = vpop.f32.mrf.mxu1  ;;  %1183 = vmatprep.mubr.msk.bf16.mxu0 %vm1313_vm0, %v1312_v1 }
 0x1dd   : > { %v744_v2 = vpack.c.bf16 %v737_v63, %v737_v63 }
 0x1e3   : > { %1184 = vmatmul.mubr.bf16.gmra.mxu0 %v744_v2 }
 0x273   : > { %v850_v3 = vpop.f32.mrf.mxu0 }
 0x274   : > { %v851_v4 = vadd.f32 %v1018_v51, %v850_v3 }
 0x275   : > { %v1161_v54 = vpop.f32.mrf.mxu0 }
 0x276   : > { %904 = vst [vmem:[%s1630_s24] sm:$0xff] %v851_v4 }
 0x277   : > { %v853_v1 = vpop.f32.mrf.mxu0 }
 0x278   : > { %v854_v5 = vadd.f32 %v1018_v51, %v853_v1 }
 0x279   : > { %v1162_v6 = vpop.f32.mrf.mxu0 }
 0x27a   : > { %905 = vst [vmem:[%s1630_s24 + $0x8] sm:$0xff] %v854_v5 }
 0x27b   : > { %v858_v7 = vpop.f32.mrf.mxu0 }
 0x27c   : > { %v859_v8 = vadd.f32 %v1018_v51, %v858_v7 }
 0x27d   : > { %v1165_v9 = vpop.f32.mrf.mxu0 }
 0x27e   : > { %906 = vst [vmem:[%s1630_s24 + $0x10] sm:$0xff] %v859_v8 }
 0x27f   : > { %v861_v10 = vpop.f32.mrf.mxu0 }
 0x280   : > { %v862_v11 = vadd.f32 %v1018_v51, %v861_v10 }
 0x281   : > { %v1166_v12 = vpop.f32.mrf.mxu0 }
 0x282   : > { %907 = vst [vmem:[%s1630_s24 + $0x18] sm:$0xff] %v862_v11 }
 0x283   : > { %v866_v13 = vpop.f32.mrf.mxu0 }
 0x284   : > { %v867_v14 = vadd.f32 %v1018_v51, %v866_v13 }
 0x285   : > { %v1169_v15 = vpop.f32.mrf.mxu0 }
 0x286   : > { %908 = vst [vmem:[%s1630_s24 + $0x20] sm:$0xff] %v867_v14 }
 0x287   : > { %v869_v16 = vpop.f32.mrf.mxu0 }
 0x288   : > { %v870_v17 = vadd.f32 %v1018_v51, %v869_v16 }
 0x289   : > { %v1170_v18 = vpop.f32.mrf.mxu0 }
 0x28a   : > { %909 = vst [vmem:[%s1630_s24 + $0x28] sm:$0xff] %v870_v17 }
 0x28b   : > { %v874_v19 = vpop.f32.mrf.mxu0 }
 0x28c   : > { %v875_v20 = vadd.f32 %v1018_v51, %v874_v19 }
 0x28d   : > { %v1173_v21 = vpop.f32.mrf.mxu0 }
 0x28e   : > { %910 = vst [vmem:[%s1630_s24 + $0x30] sm:$0xff] %v875_v20 }
 0x28f   : > { %v877_v22 = vpop.f32.mrf.mxu0 }
 0x290   : > { %v878_v23 = vadd.f32 %v1018_v51, %v877_v22 }
 0x291   : > { %v1174_v24 = vpop.f32.mrf.mxu0 }
 0x292   : > { %911 = vst [vmem:[%s1630_s24 + $0x38] sm:$0xff] %v878_v23 }
 0x293   : > { %v882_v25 = vpop.f32.mrf.mxu0 }
 0x294   : > { %v883_v26 = vadd.f32 %v1018_v51, %v882_v25 }
 0x295   : > { %v1177_v27 = vpop.f32.mrf.mxu0 }
 0x296   : > { %912 = vst [vmem:[%s1630_s24 + $0x40] sm:$0xff] %v883_v26 }
 0x297   : > { %v885_v28 = vpop.f32.mrf.mxu0 }
 0x298   : > { %v886_v29 = vadd.f32 %v1018_v51, %v885_v28 }
 0x299   : > { %v1178_v30 = vpop.f32.mrf.mxu0 }
 0x29a   : > { %913 = vst [vmem:[%s1630_s24 + $0x48] sm:$0xff] %v886_v29 }
 0x29b   : > { %v890_v31 = vpop.f32.mrf.mxu0 }
 0x29c   : > { %v891_v32 = vadd.f32 %v1018_v51, %v890_v31 }
 0x29d   : > { %v1181_v33 = vpop.f32.mrf.mxu0 }
 0x29e   : > { %914 = vst [vmem:[%s1630_s24 + $0x50] sm:$0xff] %v891_v32 }
 0x29f   : > { %v893_v34 = vpop.f32.mrf.mxu0 }
 0x2a0   : > { %v894_v36 = vadd.f32 %v1018_v51, %v893_v34 }
 0x2a1   : > { %v1182_v37 = vpop.f32.mrf.mxu0 }
 0x2a2   : > { %915 = vst [vmem:[%s1630_s24 + $0x58] sm:$0xff] %v894_v36 }
 0x2a3   : > { %v898_v39 = vpop.f32.mrf.mxu0 }
 0x2a4   : > { %v899_v40 = vadd.f32 %v1018_v51, %v898_v39 }
 0x2a5   : > { %v1185_v41 = vpop.f32.mrf.mxu0 }
 0x2a6   : > { %916 = vst [vmem:[%s1630_s24 + $0x60] sm:$0xff] %v899_v40 }
 0x2a7   : > { %v901_v42 = vpop.f32.mrf.mxu0 }
 0x2a8   : > { %1263 = shalt.err (!%p1260_p3)
}
 0x2a9   : > { %s1264_s17 = scalar_lea.hbm %s1649_s29, 1664  ;;  %s1268_s25 = scalar_lea.hbm %s1705_s9, 3328 }
 0x2aa   : > { %p1265_p4 = scmp.ne.s32.totalorder %s1649_s29, %s1264_s17  ;;  %p1269_p9 = scmp.lt.s32.totalorder %s1649_s29, %s1705_s9 }
 0x2ab   : > { %p1270_p10 = scmp.lt.s32.totalorder %s1268_s25, %s1264_s17 }
 0x2ac   : > { %p1266_p7 = pnand %p1265_p4, %p1405_p5 }
 0x2ad   : > { %p1271_p11 = por %p1270_p10, %p1269_p9 }
 0x2ae   : > { %p1267_p8 = pneg %p1266_p7 }
 0x2b0   : > { %p1272_p12 = pnand %p1271_p11, %p1267_p8 }
 0x2b2   : > { %1275 = shalt.err (!%p1272_p12)
}
 0x2b3   : > { %s1315_s14 = smov 128   ;;  %s1316_s16 = smov 8   ;;  %v1186_v43 = vpop.f32.mrf.mxu0 }
 0x2b4   : > { %1190 = dma.vmem_to_hbm [thread:$0]  (%p1405_p5), %s1651_s26, 1664, %s1649_s29, %s1656_s13, %s1315_s14, %s1315_s14, %s1316_s16  }
 0x2b5 PF: > { %p1196_p13 = scmp.ge.s32.totalorder %s1310_s12, 2  ;;  %s946_s21 = sand.u32 1, %s1298_s30  }
 0x2b6   : > { %s947_s22 = scalar_lea.sflag [#allocation3], %s946_s21 }
 0x2b7   : > { %p1193_p0 = pnand %p1196_p13, %p1409_p6 }
 0x2b9   : > { %p1194_p1 = pneg %p1193_p0 }
 0x2bb   : > { %1293 = dma.done.wait (%p1194_p1), %s947_s22, 1664  }
 0x2bc   : > { %1295 = vsyncadd (%p1194_p1), %s947_s22, 4294965632  ;;  %p19_p2 = scmp.ge.s32.totalorder %s1392_s15, 4   ;;  %s1708_s30 = smov %s1302_s10 }
 0x2bd   : > { %s1709_s10 = smov %s1306_s11  ;;  %s1710_s11 = smov %s1403_s18 }
 0x2be   : > { %s1711_s12 = smov %s1392_s15  ;;  %21 = sbr.rel (!%p19_p2) target bundleno = 3 (0x3), region = 91 }
 0x2c3   :  { %952 = vsyncpa [#allocation3], 1 }
 0x2c4   :  { %954 = vsyncpa [#allocation3 + $0x1], 1 }

</bundles_post_ra>
